<compile_context>
chip_gen: v7x
topology: tpu7x:2x2x1
jax: 0.10.0
libtpu: 0.0.40
codegen_flags: <defaults>
</compile_context>

<pallas_src>
import functools

import jax
import jax.numpy as jnp
from jax.experimental import pallas as pl
from jax.experimental.pallas import tpu as pltpu

_VMEM_LIMIT = 32 * 1024 * 1024  # explicit, safe on v5e/v6e/v7x


# ------------------------------ tile helpers --------------------------------

def _pick_tile(dim, pref, align):
    """Largest multiple of `align` (<= pref) dividing `dim`; else the full dim.

    Guarantees block shapes are either (8,128)-aligned or equal to the array
    extent, so the same kernels run at tiny demo shapes and production sizes.
    """
    if dim <= pref or dim % align != 0:
        return dim
    t = pref - (pref % align)
    while t >= align:
        if dim % t == 0:
            return t
        t -= align
    return dim


# ------------------------ tiled matmul (+bias/gelu/res) ----------------------

def _matmul_kernel(x_ref, w_ref, *rest, act, has_bias, has_res):
    acc_ref = rest[-1]
    o_ref = rest[-2]
    extra = rest[:-2]
    p = 0
    bias_ref = None
    res_ref = None
    if has_bias:
        bias_ref = extra[p]
        p += 1
    if has_res:
        res_ref = extra[p]

    k = pl.program_id(2)

    @pl.when(k == 0)
    def _():
        acc_ref[...] = jnp.zeros_like(acc_ref)

    acc_ref[...] += jnp.dot(
        x_ref[...].astype(w_ref.dtype), w_ref[...],
        preferred_element_type=jnp.float32)

    @pl.when(k == pl.num_programs(2) - 1)
    def _():
        y = acc_ref[...]
        if has_bias:
            y = y + bias_ref[...].astype(jnp.float32)
        if act == "gelu":
            # torch.nn.GELU() default = exact (erf) gelu
            y = jax.nn.gelu(y, approximate=False)
        if has_res:
            y = y + res_ref[...].astype(jnp.float32)
        o_ref[...] = y.astype(o_ref.dtype)


def matmul(x, w, bias=None, res=None, act="none", out_dtype=jnp.float32,
           tm=256, tn=512, tk=512):
    """y = act(x @ w + bias) + res with an (M, N, K) grid and fp32 accumulator.

    x: [M, K] (cast to w.dtype for the MXU), w: [K, N] bf16 (pre-transposed),
    bias: [N] fp32, res: [M, N] fp32 (fused into the epilogue)."""
    M, K = x.shape
    K2, N = w.shape
    assert K == K2
    TM = _pick_tile(M, tm, 8)
    TN = _pick_tile(N, tn, 128)
    TK = _pick_tile(K, tk, 128)
    grid = (M // TM, N // TN, K // TK)

    in_specs = [
        pl.BlockSpec((TM, TK), lambda i, j, k: (i, k)),
        pl.BlockSpec((TK, TN), lambda i, j, k: (k, j)),
    ]
    args = [x, w]
    if bias is not None:
        in_specs.append(pl.BlockSpec((1, TN), lambda i, j, k: (0, j)))
        args.append(bias.reshape(1, N))
    if res is not None:
        in_specs.append(pl.BlockSpec((TM, TN), lambda i, j, k: (i, j)))
        args.append(res)

    return pl.pallas_call(
        functools.partial(_matmul_kernel, act=act,
                          has_bias=bias is not None, has_res=res is not None),
        out_shape=jax.ShapeDtypeStruct((M, N), out_dtype),
        grid=grid,
        in_specs=in_specs,
        out_specs=pl.BlockSpec((TM, TN), lambda i, j, k: (i, j)),
        scratch_shapes=[pltpu.VMEM((TM, TN), jnp.float32)],
        compiler_params=pltpu.CompilerParams(
            dimension_semantics=("parallel", "parallel", "arbitrary"),
            vmem_limit_bytes=_VMEM_LIMIT),
    )(*args)


# --------------------- fused LayerNorm + matmul (+gelu) ----------------------

def _ln_matmul_kernel(x_ref, g_ref, b_ref, w_ref, bias_ref, o_ref, *, eps, act):
    x = x_ref[...].astype(jnp.float32)                      # [TM, D]
    mu = jnp.mean(x, axis=-1, keepdims=True)
    xc = x - mu
    var = jnp.mean(xc * xc, axis=-1, keepdims=True)
    h = xc * jax.lax.rsqrt(var + eps)
    h = h * g_ref[...] + b_ref[...]                         # fp32 LN
    y = jnp.dot(h.astype(w_ref.dtype), w_ref[...],
                preferred_element_type=jnp.float32)
    y = y + bias_ref[...].astype(jnp.float32)
    if act == "gelu":
        y = jax.nn.gelu(y, approximate=False)
    o_ref[...] = y.astype(o_ref.dtype)


def ln_matmul(x, g, b, w, bias, act="none", out_dtype=jnp.bfloat16,
              eps=1e-5, tm=256, tn=512):
    """act(LayerNorm(x) @ w + bias).  LN needs the full row, so K is unsplit
    (K = ViT width, small); the (M, N) grid is fully parallel."""
    M, D = x.shape
    D2, N = w.shape
    assert D == D2
    TM = _pick_tile(M, tm, 8)
    TN = _pick_tile(N, tn, 128)
    return pl.pallas_call(
        functools.partial(_ln_matmul_kernel, eps=eps, act=act),
        out_shape=jax.ShapeDtypeStruct((M, N), out_dtype),
        grid=(M // TM, N // TN),
        in_specs=[
            pl.BlockSpec((TM, D), lambda i, j: (i, 0)),
            pl.BlockSpec((1, D), lambda i, j: (0, 0)),
            pl.BlockSpec((1, D), lambda i, j: (0, 0)),
            pl.BlockSpec((D, TN), lambda i, j: (0, j)),
            pl.BlockSpec((1, TN), lambda i, j: (0, j)),
        ],
        out_specs=pl.BlockSpec((TM, TN), lambda i, j: (i, j)),
        compiler_params=pltpu.CompilerParams(
            dimension_semantics=("parallel", "parallel"),
            vmem_limit_bytes=_VMEM_LIMIT),
    )(x, g.reshape(1, D), b.reshape(1, D), w, bias.reshape(1, N))


# ------------------- fused positional-embedding add + ln_pre -----------------

def _ln_posadd_kernel(x_ref, pos_ref, g_ref, b_ref, o_ref, *, eps):
    x = x_ref[0].astype(jnp.float32) + pos_ref[...].astype(jnp.float32)
    mu = jnp.mean(x, axis=-1, keepdims=True)
    xc = x - mu
    var = jnp.mean(xc * xc, axis=-1, keepdims=True)
    y = xc * jax.lax.rsqrt(var + eps)
    o_ref[0] = (y * g_ref[...] + b_ref[...]).astype(o_ref.dtype)


def layernorm_posadd(x, pos, g, b, eps=1e-5, ts=512):
    """LayerNorm(x + pos) — ln_pre with the positional-embedding add fused in.
    The output is the fp32 residual stream, so it must materialize."""
    B, S, D = x.shape
    TS = _pick_tile(S, ts, 8)
    return pl.pallas_call(
        functools.partial(_ln_posadd_kernel, eps=eps),
        out_shape=jax.ShapeDtypeStruct((B, S, D), jnp.float32),
        grid=(B, S // TS),
        in_specs=[
            pl.BlockSpec((1, TS, D), lambda bi, si: (bi, si, 0)),
            pl.BlockSpec((TS, D), lambda bi, si: (si, 0)),
            pl.BlockSpec((1, D), lambda bi, si: (0, 0)),
            pl.BlockSpec((1, D), lambda bi, si: (0, 0)),
        ],
        out_specs=pl.BlockSpec((1, TS, D), lambda bi, si: (bi, si, 0)),
        compiler_params=pltpu.CompilerParams(
            dimension_semantics=("parallel", "parallel"),
            vmem_limit_bytes=_VMEM_LIMIT),
    )(x, pos, g.reshape(1, D), b.reshape(1, D))


# -------------------------------- attention ----------------------------------

def _attn_kernel(qkv_ref, o_ref, *, heads, scale):
    qkv = qkv_ref[0]                                        # [S, 3D] bf16
    D = qkv.shape[-1] // 3
    Dh = D // heads
    outs = []
    for h in range(heads):                                  # static unroll
        q = qkv[:, h * Dh:(h + 1) * Dh]
        k = qkv[:, D + h * Dh:D + (h + 1) * Dh]
        v = qkv[:, 2 * D + h * Dh:2 * D + (h + 1) * Dh]
        # contract on the last axis of both q and k -> no K transpose on the XLU
        s = jax.lax.dot_general(q, k, (((1,), (1,)), ((), ())),
                                preferred_element_type=jnp.float32) * scale
        s = s - jnp.max(s, axis=-1, keepdims=True)          # fp32 softmax
        p = jnp.exp(s)
        p = p * pl.reciprocal(jnp.sum(p, axis=-1, keepdims=True), approx=True)
        outs.append(jnp.dot(p.astype(v.dtype), v,
                            preferred_element_type=jnp.float32))
    # heads concatenated along features -> one lane-dense D-wide store
    o_ref[0] = jnp.concatenate(outs, axis=-1).astype(o_ref.dtype)


def attention(qkv, heads):
    """qkv: [B, S, 3D] packed (q|k|v, heads contiguous inside each).  Returns
    the head-concatenated attention output [B, S, D] directly, avoiding all
    reshape/transpose glue and masked sub-128-lane stores."""
    B, S, D3 = qkv.shape
    D = D3 // 3
    Dh = D // heads
    return pl.pallas_call(
        functools.partial(_attn_kernel, heads=heads, scale=Dh ** -0.5),
        out_shape=jax.ShapeDtypeStruct((B, S, D), jnp.bfloat16),
        grid=(B,),
        in_specs=[pl.BlockSpec((1, S, D3), lambda b: (b, 0, 0))],
        out_specs=pl.BlockSpec((1, S, D), lambda b: (b, 0, 0)),
        compiler_params=pltpu.CompilerParams(
            dimension_semantics=("parallel",),
            vmem_limit_bytes=_VMEM_LIMIT),
    )(qkv)


# ------------------------- ViT forward (glue + kernels) ----------------------

def residual_attention_block(x2d, blk, heads, B, S):
    """open_clip.transformer.ResidualAttentionBlock (pre-norm, ls_1/ls_2 = Identity).
    x2d: [B*S, D] fp32 residual stream."""
    D = x2d.shape[-1]

    # attention branch: ln_1 fused into the QKV projection
    qkv = ln_matmul(x2d, blk["ln1_g"], blk["ln1_b"],
                    blk["in_proj_w"], blk["in_proj_b"],
                    out_dtype=jnp.bfloat16)                  # [B*S, 3D]
    o = attention(qkv.reshape(B, S, 3 * D), heads)           # [B, S, D] bf16
    # out_proj with the residual add fused into the matmul epilogue
    x2d = matmul(o.reshape(B * S, D), blk["out_proj_w"], blk["out_proj_b"],
                 res=x2d, out_dtype=jnp.float32)

    # MLP branch: ln_2 + exact GELU fused into c_fc; residual fused into c_proj
    hmid = ln_matmul(x2d, blk["ln2_g"], blk["ln2_b"],
                     blk["fc_w"], blk["fc_b"], act="gelu",
                     out_dtype=jnp.bfloat16)                 # [B*S, 4D]
    x2d = matmul(hmid, blk["proj_w"], blk["proj_b"],
                 res=x2d, out_dtype=jnp.float32)
    return x2d


def forward_intermediates(params, pixel_values, *, patch, heads, layers):
    """Mirrors OpenCLIPVisionViTBackbone.forward_intermediates with
    n = {layers - 2} (penultimate block), norm=False, intermediates_only=True."""
    B, C, H, W = pixel_values.shape
    gh, gw = H // patch, W // patch
    n_patches = gh * gw
    width = params["class_embedding"].shape[0]

    # conv1 (kernel=stride=patch, bias=False) as im2col + tiled Pallas matmul
    xp = pixel_values.reshape(B, C, gh, patch, gw, patch)
    xp = xp.transpose(0, 2, 4, 1, 3, 5).reshape(B * n_patches, C * patch * patch)
    tok = matmul(xp, params["w_patch"], out_dtype=jnp.float32)
    tok = tok.reshape(B, n_patches, width)                   # == reshape+permute in torch

    cls = jnp.broadcast_to(params["class_embedding"][None, None, :], (B, 1, width))
    x = jnp.concatenate([cls, tok], axis=1)                  # [B, S, D]
    # patch_dropout is Identity in eval mode.
    S = n_patches + 1
    # ln_pre with the positional-embedding add fused in -> fp32 residual stream
    x2d = layernorm_posadd(x, params["positional_embedding"],
                           params["ln_pre_g"], params["ln_pre_b"]
                           ).reshape(B * S, width)

    take_index = layers - 2
    inter = None
    for i in range(layers):
        x2d = residual_attention_block(x2d, params["blocks"][i], heads, B, S)
        if i == take_index:
            inter = x2d.reshape(B, S, width)
            break                   # intermediates_only=True; deeper blocks don't affect output

    pooled = inter[:, 0]            # _global_pool('tok') pooled = CLS token
    patch_tokens = inter[:, 1:]     # all patch features
    # TODO(synk): the reference literally appends the pooled CLS token `p` even though the
    # docstring promises "all patch features"; we return the patch tokens and expose pooled too.
    return patch_tokens, pooled


# -------------------------------- parameters ---------------------------------

def init_params(key, *, C, patch, width, heads, layers, seq):
    mlp = 4 * width

    def nrm(k, shape, scale=0.02):
        return scale * jax.random.normal(k, shape, jnp.float32)

    keys = jax.random.split(key, 3 + 6 * layers)
    it = iter(keys)

    conv_w = nrm(next(it), (width, C, patch, patch))          # torch: [out, in, kh, kw]
    params = {
        # pre-transposed to [C*p*p, width] and cast to bf16 once (MXU operand)
        "w_patch": conv_w.reshape(width, C * patch * patch).T.astype(jnp.bfloat16),
        "class_embedding": nrm(next(it), (width,)),
        "positional_embedding": nrm(next(it), (seq, width)),
        "ln_pre_g": jnp.ones((width,), jnp.float32),
        "ln_pre_b": jnp.zeros((width,), jnp.float32),
        "blocks": [],
    }
    for _l in range(layers):
        blk = {
            "ln1_g": jnp.ones((width,), jnp.float32),
            "ln1_b": jnp.zeros((width,), jnp.float32),
            # weights stored already as [K, N] bf16 (one-time transpose + cast)
            "in_proj_w": nrm(next(it), (3 * width, width)).T.astype(jnp.bfloat16),
            "in_proj_b": nrm(next(it), (3 * width,)),
            "out_proj_w": nrm(next(it), (width, width)).T.astype(jnp.bfloat16),
            "out_proj_b": jnp.zeros((width,), jnp.float32),
            "ln2_g": jnp.ones((width,), jnp.float32),
            "ln2_b": jnp.zeros((width,), jnp.float32),
            "fc_w": nrm(next(it), (mlp, width)).T.astype(jnp.bfloat16),   # c_fc
            "fc_b": nrm(next(it), (mlp,)),
            "proj_w": nrm(next(it), (width, mlp)).T.astype(jnp.bfloat16), # c_proj
            "proj_b": jnp.zeros((width,), jnp.float32),
        }
        params["blocks"].append(blk)
    return params


# ----------------------------------- main -------------------------------------

if __name__ == "__main__":
    B, C, H, W = 2, 3, 16, 16
    patch, width, heads, layers = 8, 32, 4, 4
    grid_hw = H // patch
    seq = grid_hw * grid_hw + 1

    root = jax.random.PRNGKey(0)
    k_params, k_x = jax.random.split(root)
    params = init_params(k_params, C=C, patch=patch, width=width,
                         heads=heads, layers=layers, seq=seq)
    pixel_values = jax.random.normal(k_x, (B, C, H, W), jnp.float32)

    patch_tokens, pooled = forward_intermediates(
        params, pixel_values, patch=patch, heads=heads, layers=layers)
    jax.block_until_ready((patch_tokens, pooled))

    assert patch_tokens.shape == (B, grid_hw * grid_hw, width)
    assert pooled.shape == (B, width)
    assert bool(jnp.all(jnp.isfinite(patch_tokens))) and bool(jnp.all(jnp.isfinite(pooled)))
    print("KERNEL_OK")
</pallas_src>

<mosaic_0001>
module attributes {stable_mosaic.version = 11 : i64} {
  func.func @_matmul_kernel(%arg0: i32, %arg1: i32, %arg2: i32, %arg3: memref<8x192xf32, #tpu.memory_space<vmem>>, %arg4: memref<192x32xbf16, #tpu.memory_space<vmem>>, %arg5: memref<8x32xf32, #tpu.memory_space<vmem>>, %arg6: memref<8x32xf32, #tpu.memory_space<vmem>>) attributes {dimension_semantics = [#tpu.dimension_semantics<parallel>, #tpu.dimension_semantics<parallel>, #tpu.dimension_semantics<arbitrary>], iteration_bounds = array<i64: 1, 1, 1>, scalar_prefetch = 0 : i64, scratch_operands = 1 : i64, tpu.core_type = #tpu.core_type<tc>, window_params = [{transform_indices = @transform_0, window_bounds = array<i64: 8, 192>}, {transform_indices = @transform_1, window_bounds = array<i64: 192, 32>}, {transform_indices = @transform_2, window_bounds = array<i64: 8, 32>}]} {
    %c0_i32 = arith.constant 0 : i32
    %0 = arith.cmpi eq, %arg2, %c0_i32 : i32
    %1 = arith.extui %0 : i1 to i32
    %c0_i32_0 = arith.constant 0 : i32
    %2 = arith.cmpi ne, %1, %c0_i32_0 : i32
    scf.if %2 {
      %cst_10 = arith.constant 0.000000e+00 : f32
      %13 = vector.broadcast %cst_10 : f32 to vector<8x32xf32>
      %c0_11 = arith.constant 0 : index
      %c0_12 = arith.constant 0 : index
      %14 = vector.load %arg6[%c0_11, %c0_12] : memref<8x32xf32, #tpu.memory_space<vmem>>, vector<8x32xf32>
      tpu.vector_store %arg6[%c0_11, %c0_12], %13 {strides = array<i32>} : memref<8x32xf32, #tpu.memory_space<vmem>>, vector<8x32xf32>,
    } else {
    }
    %c0 = arith.constant 0 : index
    %c0_1 = arith.constant 0 : index
    %3 = vector.load %arg6[%c0, %c0_1] : memref<8x32xf32, #tpu.memory_space<vmem>>, vector<8x32xf32>
    %c0_2 = arith.constant 0 : index
    %c0_3 = arith.constant 0 : index
    %4 = vector.load %arg3[%c0_2, %c0_3] : memref<8x192xf32, #tpu.memory_space<vmem>>, vector<8x192xf32>
    %5 = arith.truncf %4 : vector<8x192xf32> to vector<8x192xbf16>
    %c0_4 = arith.constant 0 : index
    %c0_5 = arith.constant 0 : index
    %6 = vector.load %arg4[%c0_4, %c0_5] : memref<192x32xbf16, #tpu.memory_space<vmem>>, vector<192x32xbf16>
    %cst = arith.constant dense<0.000000e+00> : vector<8x32xf32>
    %7 = tpu.matmul %5, %6, %cst {dimension_numbers = #tpu.dot_dimension_numbers<[1], [0], [0], [1], [0, 0, 1, 1], [], []>} : vector<8x192xbf16>, vector<192x32xbf16>, vector<8x32xf32> -> vector<8x32xf32>
    %8 = arith.addf %3, %7 : vector<8x32xf32>
    %c0_6 = arith.constant 0 : index
    %c0_7 = arith.constant 0 : index
    %9 = vector.load %arg6[%c0_6, %c0_7] : memref<8x32xf32, #tpu.memory_space<vmem>>, vector<8x32xf32>
    tpu.vector_store %arg6[%c0_6, %c0_7], %8 {strides = array<i32>} : memref<8x32xf32, #tpu.memory_space<vmem>>, vector<8x32xf32>,
    %c0_i32_8 = arith.constant 0 : i32
    %10 = arith.cmpi eq, %arg2, %c0_i32_8 : i32
    %11 = arith.extui %10 : i1 to i32
    %c0_i32_9 = arith.constant 0 : i32
    %12 = arith.cmpi ne, %11, %c0_i32_9 : i32
    scf.if %12 {
      %c0_10 = arith.constant 0 : index
      %c0_11 = arith.constant 0 : index
      %13 = vector.load %arg6[%c0_10, %c0_11] : memref<8x32xf32, #tpu.memory_space<vmem>>, vector<8x32xf32>
      %c0_12 = arith.constant 0 : index
      %c0_13 = arith.constant 0 : index
      %14 = vector.load %arg5[%c0_12, %c0_13] : memref<8x32xf32, #tpu.memory_space<vmem>>, vector<8x32xf32>
      tpu.vector_store %arg5[%c0_12, %c0_13], %13 {strides = array<i32>} : memref<8x32xf32, #tpu.memory_space<vmem>>, vector<8x32xf32>,
    } else {
    }
    return
  }
  func.func @transform_0(%arg0: i32, %arg1: i32, %arg2: i32) -> (i32, i32) {
    %c0_i32 = arith.constant 0 : i32
    return %arg0, %arg2 : i32, i32
  }
  func.func @transform_1(%arg0: i32, %arg1: i32, %arg2: i32) -> (i32, i32) {
    %c0_i32 = arith.constant 0 : i32
    return %arg2, %arg1 : i32, i32
  }
  func.func @transform_2(%arg0: i32, %arg1: i32, %arg2: i32) -> (i32, i32) {
    %c0_i32 = arith.constant 0 : i32
    return %arg0, %arg1 : i32, i32
  }
}

</mosaic_0001>

<bundles_post_ra>
// kernel: tpu_custom_call.1
= control target key start
LH: loop header
LB: loop body
LE: loop exit
PB: predicated region body
PF: predicated region fallthrough
CT: control target
= control target key end

     0   :  { %v238_v1 = vmov 0   ;;  %vm17_vm0 = vcmask 261120   ;;  %v239_v3 = vmov 0.0   ;;  %vm120_vm1 = vcmask 523264   ;;  %s313_s0 = inlined_call_operand.vmem [shape: f32[8,192], index: 0, kind: input, shape index: {}]   ;;  %s314_s1 = inlined_call_operand.vmem [shape: bf16[192,32], index: 1, kind: input, shape index: {}]   ;;  %s315_s2 = inlined_call_operand.hbm [shape: f32[8,32], index: 2, kind: output, shape index: {}]  }
   0x1   :  { %v202_v0 = vld [vmem:[%s314_s1] sm:$0xff]   ;;  %124 = vmatprep.subr.bf16.mxu0 %v238_v1  ;;  %v203_v2 = vld [vmem:[%s314_s1 + $0x8] sm:$0xff]   ;;  %18 = vst.msk [vmem:[#allocation2] sm:$0xff] %vm17_vm0, %v239_v3  ;;  %v204_v4 = vld [vmem:[%s314_s1 + $0x10] sm:$0xff]  }
   0x2   :  { %125 = vmatpush1.bf16.msra.mxu0 %v202_v0  ;;  %v205_v5 = vld [vmem:[%s314_s1 + $0x18] sm:$0xff]   ;;  %v21_v6 = vld [vmem:[%s313_s0 + $0x8] sm:$0xff] }
   0x3   :  { %126 = vmatprep.subr.bf16.mxu0 %v238_v1  ;;  %v23_v7 = vpack.c.bf16 %v21_v6, %v21_v6 }
   0x6   :  { %127 = vmatpush1.bf16.msra.mxu0 %v203_v2 }
   0x7   :  { %128 = vmatprep.subr.bf16.mxu0 %v238_v1 }
   0xa   :  { %129 = vmatpush1.bf16.msra.mxu0 %v204_v4 }
   0xb   :  { %130 = vmatprep.subr.bf16.mxu0 %v238_v1 }
   0xc   :  { %7 = vsyncpa [#allocation4], 0  ;;  %v206_v8 = vld [vmem:[%s314_s1 + $0x20] sm:$0xff]   ;;  %198 = vmatprep.mubr.msk.bf16.mxu0 %vm120_vm1, %v23_v7  ;;  %v207_v9 = vld [vmem:[%s314_s1 + $0x28] sm:$0xff]   ;;  %s240_s9 = smov [#allocation3]  }
   0xd   :  { %v208_v10 = vld [vmem:[%s314_s1 + $0x30] sm:$0xff]   ;;  %v209_v11 = vld [vmem:[%s314_s1 + $0x38] sm:$0xff]   ;;  %v210_v12 = vld [vmem:[%s314_s1 + $0x40] sm:$0xff]   ;;  %s178_s10 = sshll.u32 %s240_s9, 4  ;;  %s179_s10 = int_to_ptr.vmem [resolvable:$true] %s178_s10 }
   0xe   :  { %131 = vmatpush1.bf16.msra.mxu0 %v205_v5  ;;  %v211_v13 = vld [vmem:[%s314_s1 + $0x48] sm:$0xff]   ;;  %v212_v14 = vld [vmem:[%s314_s1 + $0x50] sm:$0xff]   ;;  %v213_v15 = vld [vmem:[%s314_s1 + $0x58] sm:$0xff]   ;;  %s214_s1 = scalar_lea.vmem %s179_s10, 128  ;;  %p219_p1 = scmp.lt.s32.totalorder %s179_s10, %s179_s10 }
   0xf   :  { %132 = vmatprep.subr.bf16.mxu0 %v238_v1  ;;  %v20_v16 = vld [vmem:[%s313_s0] sm:$0xff]  ;;  %p215_p0 = scmp.ne.s32.totalorder %s179_s10, %s214_s1  ;;  %p220_p2 = scmp.lt.s32.totalorder %s214_s1, %s214_s1 }
  0x10   :  { %v22_v17 = vpack.c.bf16 %v20_v16, %v20_v16  ;;  %v19_v18 = vld [vmem:[#allocation2] sm:$0xff] }
  0x11   :  { %p221_p3 = por %p220_p2, %p219_p1 }
  0x12   :  { %133 = vmatpush1.bf16.msra.mxu0 %v206_v8 }
  0x13   :  { %134 = vmatprep.subr.bf16.mxu0 %v238_v1  ;;  %p222_p4 = pnand %p221_p3, %p215_p0 }
  0x16   :  { %135 = vmatpush1.bf16.msra.mxu0 %v207_v9 }
  0x17   :  { %136 = vmatprep.subr.bf16.mxu0 %v238_v1 }
  0x1a   :  { %137 = vmatpush1.bf16.msra.mxu0 %v208_v10 }
  0x1b   :  { %138 = vmatprep.subr.bf16.mxu0 %v238_v1 }
  0x1e   :  { %139 = vmatpush1.bf16.msra.mxu0 %v209_v11 }
  0x1f   :  { %140 = vmatprep.subr.bf16.mxu0 %v238_v1 }
  0x22   :  { %141 = vmatpush1.bf16.msra.mxu0 %v210_v12 }
  0x23   :  { %142 = vmatprep.subr.bf16.mxu0 %v238_v1 }
  0x26   :  { %143 = vmatpush1.bf16.msra.mxu0 %v211_v13 }
  0x27   :  { %144 = vmatprep.subr.bf16.mxu0 %v238_v1 }
  0x2a   :  { %145 = vmatpush1.bf16.msra.mxu0 %v212_v14 }
  0x2b   :  { %146 = vmatprep.subr.bf16.mxu0 %v238_v1 }
  0x2e   :  { %147 = vmatpush1.bf16.msra.mxu0 %v213_v15 }
  0x31   :  { %157 = vmatmul.mubr.bf16.vlgmr.msra.gmra.mrb[0].mxu0 %v22_v17 }
 0x104   :  { %v158_v19 = vpop.f32.mrb[0].mxu0 }
 0x105   :  { %v164_v20 = vadd.f32 %v158_v19, %v19_v18  ;;  %v160_v21 = vpop.f32.mrb[1].mxu0 }
 0x106   :  { %v161_v22 = vpop.f32.mrb[2].mxu0 }
 0x107   :  { %166 = vst.msk [vmem:[#allocation2] sm:$0xff] %vm17_vm0, %v164_v20  ;;  %v162_v23 = vpop.f32.mrb[3].mxu0 }
 0x10e   :  { %v170_v24 = vld [vmem:[#allocation2] sm:$0xff] }
 0x10f   :  { %171 = vst.msk [vmem:[#allocation3] sm:$0xff] %vm17_vm0, %v170_v24 }
 0x110   :  { %225 = shalt.err (!%p222_p4)
}
 0x111   :  { %s226_s12 = scalar_lea.hbm %s315_s2, 128 }
 0x112   :  { %p227_p5 = scmp.ne.s32.totalorder %s315_s2, %s226_s12  ;;  %p230_p6 = scmp.lt.u32.totalorder %s226_s12, %s315_s2 }
 0x114   :  { %p232_p7 = pnand %p230_p6, %p227_p5 }
 0x116   :  { %235 = shalt.err (!%p232_p7)
}
 0x117   :  { %181 = dma.vmem_to_hbm [thread:$0]  %s179_s10, 128, %s315_s2, [#allocation4]  }
 0x118   :  { %236 = dma.done.wait [#allocation4], 128  }
 0x119   :  { %237 = vsyncadd [#allocation4], 4294967168 }
 0x11a   :  { %185 = vsyncpa [#allocation4], 1 }

</bundles_post_ra>
